<compile_context>
chip_gen: v7x
topology: tpu7x:2x2x1
jax: 0.10.0
libtpu: 0.0.40
codegen_flags: <defaults>
</compile_context>

<pallas_src>
import jax
import jax.numpy as jnp
from jax.experimental import pallas as pl
from jax.experimental.pallas import tpu as pltpu

_LANES = 128  # vreg lane width


def _vmem_capacity_bytes():
    """Per-core VMEM capacity; conservative 64 MiB (v7x) if the query fails."""
    try:
        cap = getattr(pltpu.get_tpu_info(), "vmem_capacity_bytes", None)
        if cap:
            return int(cap)
    except Exception:
        pass
    return 64 << 20


def _has_bf16_vpu():
    """True on chips whose VPU has bf16 ALUs (v6e and newer)."""
    try:
        kind = jax.devices()[0].device_kind.lower()
    except Exception:
        return False
    return not any(tag in kind for tag in ("v2", "v3", "v4", "v5"))


def _row_pack(dtype):
    """Sublane packing: 8 rows for 4-byte, 16 for 2-byte, 32 for 1-byte dtypes."""
    return max(8, 32 // jnp.dtype(dtype).itemsize)


def _make_linear_kernel(compute_dtype):
    def linear_kernel(wb_ref, x_ref, o_ref):
        # wb_ref: (2,) f32 in SMEM (scalar-prefetched) -> [weight, bias].
        # x_ref / o_ref: (TR, 128) VMEM tiles.
        w = wb_ref[0].astype(compute_dtype)
        b = wb_ref[1].astype(compute_dtype)
        o_ref[...] = (x_ref[...].astype(compute_dtype) * w + b).astype(o_ref.dtype)

    return linear_kernel


def linear_forward(x, weight, bias, *, max_tile_bytes=None):
    """Linear(1, 1): y = x @ W^T + b for x of shape (..., 1).

    The flattened input is viewed as a lane-dense (rows, 128) slab (zero-copy
    when 128 divides x.size), streamed through auto double-buffered VMEM tiles
    sized from the chip's VMEM capacity, and reshaped back to x.shape.
    """
    orig_shape = x.shape
    dtype = x.dtype
    n = int(x.size)
    itemsize = jnp.dtype(dtype).itemsize

    if n == 0:
        return jnp.zeros(orig_shape, dtype)

    # Fold weight & bias into one (2,) f32 array; scalar-prefetched to SMEM.
    wb = jnp.concatenate(
        [jnp.asarray(weight).reshape(-1), jnp.asarray(bias).reshape(-1)]
    ).astype(jnp.float32)

    # --- lane-dense (rows, 128) view ----------------------------------------
    flat = x.reshape(-1)                       # free (bitcast)
    c = _LANES
    pad = (-n) % c
    if pad:
        # Lane-misaligned N: one extra HBM pass in, one out.  Unavoidable for a
        # lane-dense 2-D view; only hit when N % 128 != 0.
        flat = jnp.pad(flat, (0, pad))
    rows = (n + pad) // c
    x2d = flat.reshape(rows, c)                # free (bitcast)

    # --- tile selection -------------------------------------------------------
    vmem_cap = _vmem_capacity_bytes()
    row_pack = _row_pack(dtype)
    if max_tile_bytes is None:
        # ~8 MiB tiles: 2 in + 2 out double-buffered ~ 32 MiB <= 50% of the
        # smallest (v7x) per-core VMEM; amortizes the ~0.35 us per-step cost.
        tile_bytes = min(8 << 20, vmem_cap // 8)
    else:
        tile_bytes = int(max_tile_bytes)
    tile_bytes = max(tile_bytes, c * row_pack * itemsize)

    tr = max(row_pack, (tile_bytes // (c * itemsize)) // row_pack * row_pack)
    if rows <= tr:
        tr = rows                              # single full-extent block
        grid = (1,)
    else:
        grid = (pl.cdiv(rows, tr),)            # ragged last block auto-masked

    # Compute dtype: bf16 in-vreg where the VPU supports it, else f32.
    if dtype == jnp.bfloat16 and _has_bf16_vpu():
        compute_dtype = jnp.bfloat16
    else:
        compute_dtype = jnp.float32

    # VMEM budget: in + out tiles, double-buffered, plus slack; <= 75% of
    # physical VMEM (leaves compiler-scratch headroom on v7x's 64 MiB).
    buffers_bytes = 2 * 2 * tr * c * itemsize
    vmem_limit = max(buffers_bytes + (4 << 20), 16 << 20)
    vmem_limit = min(vmem_limit, (vmem_cap * 3) // 4)

    y2d = pl.pallas_call(
        _make_linear_kernel(compute_dtype),
        out_shape=jax.ShapeDtypeStruct((rows, c), dtype),
        grid_spec=pltpu.PrefetchScalarGridSpec(
            num_scalar_prefetch=1,             # wb -> SMEM, once, before the grid
            grid=grid,
            in_specs=[pl.BlockSpec((tr, c), lambda i, _wb: (i, 0))],
            out_specs=pl.BlockSpec((tr, c), lambda i, _wb: (i, 0)),
        ),
        compiler_params=pltpu.CompilerParams(
            dimension_semantics=("parallel",),  # shard tiles across TCs on v7x
            vmem_limit_bytes=int(vmem_limit),
        ),
        cost_estimate=pl.CostEstimate(
            flops=2 * rows * c,
            transcendentals=0,
            bytes_accessed=2 * rows * c * itemsize,
        ),
    )(wb, x2d)

    y = y2d.reshape(-1)                         # free (bitcast)
    if pad:
        y = y[:n]
    return y.reshape(orig_shape)


if __name__ == "__main__":
    key = jax.random.PRNGKey(0)
    kx, kw, kb, kx2, kx3 = jax.random.split(key, 5)

    # PyTorch default init for Linear(1, 1): U(-1/sqrt(fan_in), 1/sqrt(fan_in)), fan_in=1.
    weight = jax.random.uniform(kw, (1, 1), minval=-1.0, maxval=1.0, dtype=jnp.float32)
    bias = jax.random.uniform(kb, (1,), minval=-1.0, maxval=1.0, dtype=jnp.float32)

    # 1) Tiny batch (lane-misaligned fallback path, single tile).
    x = jax.random.normal(kx, (8, 1), dtype=jnp.float32)
    y = jax.block_until_ready(linear_forward(x, weight, bias))
    y_ref = x @ weight.T + bias
    assert y.shape == x.shape
    assert jnp.allclose(y, y_ref, atol=1e-6, rtol=1e-5)

    # 2) Lane-aligned batch (zero-copy path: no pad, no slice, one full block).
    x2 = jax.random.normal(kx2, (8192, 1), dtype=jnp.float32)
    y2 = jax.block_until_ready(linear_forward(x2, weight, bias))
    y2_ref = x2 @ weight.T + bias
    assert y2.shape == x2.shape
    assert jnp.allclose(y2, y2_ref, atol=1e-6, rtol=1e-5)

    # 3) Multi-tile path with a ragged (masked) last row-block; small tiles are
    #    forced only to exercise the pipeline at a small test size.
    x3 = jax.random.normal(kx3, (25600, 1), dtype=jnp.float32)
    y3 = jax.block_until_ready(
        linear_forward(x3, weight, bias, max_tile_bytes=32 << 10)
    )
    y3_ref = x3 @ weight.T + bias
    assert y3.shape == x3.shape
    assert jnp.allclose(y3, y3_ref, atol=1e-6, rtol=1e-5)

    print("KERNEL_OK")
</pallas_src>

<mosaic_0001>
module attributes {stable_mosaic.version = 11 : i64} {
  func.func @linear_kernel(%arg0: i32, %arg1: memref<2xf32, #tpu.memory_space<smem>>, %arg2: memref<1x128xf32, #tpu.memory_space<vmem>>, %arg3: memref<1x128xf32, #tpu.memory_space<vmem>>) attributes {dimension_semantics = [#tpu.dimension_semantics<parallel>], iteration_bounds = array<i64: 1>, scalar_prefetch = 1 : i64, scratch_operands = 0 : i64, tpu.core_type = #tpu.core_type<tc>, window_params = [{transform_indices = @transform_0, window_bounds = array<i64: 1, 128>}, {transform_indices = @transform_1, window_bounds = array<i64: 1, 128>}]} {
    %c0 = arith.constant 0 : index
    %0 = memref.load %arg1[%c0] : memref<2xf32, #tpu.memory_space<smem>>
    %c1 = arith.constant 1 : index
    %1 = memref.load %arg1[%c1] : memref<2xf32, #tpu.memory_space<smem>>
    %c0_0 = arith.constant 0 : index
    %c0_1 = arith.constant 0 : index
    %2 = vector.load %arg2[%c0_0, %c0_1] : memref<1x128xf32, #tpu.memory_space<vmem>>, vector<1x128xf32>
    %3 = vector.broadcast %0 : f32 to vector<1x128xf32>
    %4 = arith.mulf %2, %3 : vector<1x128xf32>
    %5 = vector.broadcast %1 : f32 to vector<1x128xf32>
    %6 = arith.addf %4, %5 : vector<1x128xf32>
    %c0_2 = arith.constant 0 : index
    %c0_3 = arith.constant 0 : index
    %7 = vector.load %arg3[%c0_2, %c0_3] : memref<1x128xf32, #tpu.memory_space<vmem>>, vector<1x128xf32>
    tpu.vector_store %arg3[%c0_2, %c0_3], %6 {strides = array<i32>} : memref<1x128xf32, #tpu.memory_space<vmem>>, vector<1x128xf32>,
    return
  }
  func.func @transform_0(%arg0: i32, %arg1: memref<2xf32, #tpu.memory_space<smem>>) -> (i32, i32) {
    %c0_i32 = arith.constant 0 : i32
    %c0_i32_0 = arith.constant 0 : i32
    return %arg0, %c0_i32 : i32, i32
  }
  func.func @transform_1(%arg0: i32, %arg1: memref<2xf32, #tpu.memory_space<smem>>) -> (i32, i32) {
    %c0_i32 = arith.constant 0 : i32
    %c0_i32_0 = arith.constant 0 : i32
    return %arg0, %c0_i32 : i32, i32
  }
}

</mosaic_0001>

<bundles_post_ra>
// kernel: tpu_custom_call.1
= control target key start
LH: loop header
LB: loop body
LE: loop exit
PB: predicated region body
PF: predicated region fallthrough
CT: control target
= control target key end

     0   :  { %s119_s0 = inlined_call_operand.hbm [shape: f32[2], index: 0, kind: input, shape index: {}]   ;;  %s120_s1 = inlined_call_operand.vmem [shape: f32[1,128], index: 1, kind: input, shape index: {}]   ;;  %s121_s2 = inlined_call_operand.hbm [shape: f32[1,128], index: 2, kind: output, shape index: {}]  }
   0x1   :  { %s39_s11 = scalar_lea.hbm %s119_s0, 16 }
   0x2   :  { %p40_p0 = scmp.ne.s32.totalorder %s119_s0, %s39_s11  ;;  %p43_p1 = scmp.lt.u32.totalorder %s39_s11, %s119_s0 }
   0x4   :  { %p45_p2 = pnand %p43_p1, %p40_p0 }
   0x6   :  { %48 = shalt.err (!%p45_p2)  }
   0x7   :  { %s75_s16 = smov [#allocation3]  }
   0x8   :  { %8 = dma.hbm_to_smem %s119_s0, 16, %s75_s16, [#allocation2] }
   0x9   :  { %71 = dma.done.wait [#allocation2], 16 }
   0xa   :  { %72 = vsyncadd [#allocation2], 4294967280 }
   0xb   :  { %10 = sfence }
   0xc   :  { %s14_s19 = sld [smem:[#allocation3]]  ;;  %s36_s20 = sld [smem:[#allocation3 + $0x1]] }
   0xd   :  { %11 = vsyncpa [#allocation5], 0  ;;  %v16_v0 = vld [vmem:[%s120_s1] sm:$0x1]  ;;  %s76_s23 = smov [#allocation4]  }
   0xe   :  { %s28_s24 = sshll.u32 %s76_s23, 4  ;;  %s29_s24 = int_to_ptr.vmem [resolvable:$true] %s28_s24 }
   0xf   :  { %s49_s25 = scalar_lea.vmem %s29_s24, 16  ;;  %s53_s0 = scalar_lea.vmem %s29_s24, 32 }
  0x10   :  { %p50_p3 = scmp.ne.s32.totalorder %s29_s24, %s49_s25  ;;  %p54_p4 = scmp.lt.s32.totalorder %s29_s24, %s29_s24 }
  0x11   :  { %p55_p5 = scmp.lt.s32.totalorder %s53_s0, %s49_s25 }
  0x12   :  { %v17_v1 = vstv %s14_s19  ;;  %v19_v2 = vstv %s36_s20 }
  0x13   :  { %v18_v3 = vmul.f32 %v17_v1, %v16_v0  ;;  %p56_p6 = por %p55_p5, %p54_p4 }
  0x15   :  { %v20_v4 = vadd.f32 %v19_v2, %v18_v3  ;;  %p57_p7 = pnand %p56_p6, %p50_p3 }
  0x17   :  { %21 = vst [vmem:[#allocation4] sm:$0x1] %v20_v4 }
  0x18   :  { %60 = shalt.err (!%p57_p7)
}
  0x19   :  { %s61_s1 = scalar_lea.hbm %s121_s2, 16 }
  0x1a   :  { %p62_p8 = scmp.ne.s32.totalorder %s121_s2, %s61_s1  ;;  %p65_p9 = scmp.lt.u32.totalorder %s61_s1, %s121_s2 }
  0x1c   :  { %p67_p10 = pnand %p65_p9, %p62_p8 }
  0x1e   :  { %70 = shalt.err (!%p67_p10)
}
  0x1f   :  { %31 = dma.vmem_to_hbm [thread:$0]  %s29_s24, 16, %s121_s2, [#allocation5]  }
  0x20   :  { %73 = dma.done.wait [#allocation5], 16  }
  0x21   :  { %74 = vsyncadd [#allocation5], 4294967280 }
  0x22   :  { %35 = vsyncpa [#allocation5], 1 }

</bundles_post_ra>
